<compile_context>
chip_gen: v5e
topology: v5e:2x2
jax: 0.10.0
libtpu: 0.0.40
codegen_flags: <defaults>
</compile_context>

<pallas_src>
import math

import jax
import jax.numpy as jnp
import numpy as np
from jax.experimental import pallas as pl
from jax.experimental.pallas import tpu as pltpu

_LANE = 128


# ---------------- Pallas kernel (fused MLP1 -> MLP2 -> log_softmax on packed rows) ----------------

def _tagger_fused_kernel(x_ref, w1_ref, b1_ref, w2_ref, b2_ref, o_ref):
    # h = leaky_relu(x @ W1 + b1); slope 0.01  ==  max(h, 0.01*h)
    h = jnp.dot(x_ref[...], w1_ref[...], preferred_element_type=jnp.float32) + b1_ref[...]
    h = jnp.maximum(h, 0.01 * h)
    # s = leaky_relu(h @ W2p + b2p); W2/b2 lane-padded, pad columns carry bias -1e9
    s = jnp.dot(h, w2_ref[...], preferred_element_type=jnp.float32) + b2_ref[...]
    s = jnp.maximum(s, 0.01 * s)
    # row-wise log_softmax (pad columns contribute exp(~-1e7) == 0 to the sum)
    z = s - jnp.max(s, axis=-1, keepdims=True)
    o_ref[...] = z - jnp.log(jnp.sum(jnp.exp(z), axis=-1, keepdims=True))


# ---------------- wrapper ----------------

def tagger_scores_packed(packed_x, w1, b1, w2, b2, *, tm=256):
    """Fused log_softmax(lrelu(lrelu(x@W1+b1)@W2+b2)) over packed rows.

    packed_x: [T, input_dim] -> returns [T, output_dim] float32 log-probs.
    """
    T, d_in = packed_x.shape
    d = w1.shape[1]
    o = w2.shape[1]

    # Lane-dense classifier: pad columns up to a multiple of 128.
    o_pad = max(_LANE, pl.cdiv(o, _LANE) * _LANE)
    w2p = jnp.zeros((d, o_pad), jnp.float32).at[:, :o].set(w2.astype(jnp.float32))
    b2p = jnp.full((1, o_pad), -1e9, jnp.float32).at[:, :o].set(
        b2.astype(jnp.float32).reshape(1, o))

    # Row-tile the packed-token axis; pad T so every block is full (pad rows are sliced off).
    n_blk = pl.cdiv(T, tm)
    t_pad = n_blk * tm
    x = packed_x.astype(jnp.float32)
    if t_pad != T:
        x = jnp.pad(x, ((0, t_pad - T), (0, 0)))

    out = pl.pallas_call(
        _tagger_fused_kernel,
        out_shape=jax.ShapeDtypeStruct((t_pad, o_pad), jnp.float32),
        grid=(n_blk,),
        in_specs=[
            pl.BlockSpec((tm, d_in), lambda i: (i, 0)),      # streamed row tile of packed x
            pl.BlockSpec((d_in, d), lambda i: (0, 0)),       # W1 resident in VMEM
            pl.BlockSpec((1, d), lambda i: (0, 0)),          # b1 resident
            pl.BlockSpec((d, o_pad), lambda i: (0, 0)),      # W2 (lane-padded) resident
            pl.BlockSpec((1, o_pad), lambda i: (0, 0)),      # b2 (lane-padded) resident
        ],
        out_specs=pl.BlockSpec((tm, o_pad), lambda i: (i, 0)),
        compiler_params=pltpu.CompilerParams(
            dimension_semantics=("parallel",),               # shard row tiles across TCs on v7x
        ),
    )(x, w1.astype(jnp.float32), b1.astype(jnp.float32).reshape(1, d), w2p, b2p)

    return out[:T, :o]


# ---------------- plain-JAX glue: packed -> padded (tiny [T, F] tensors only) ----------------

def pad_packed(data, batch_sizes, pad_row):
    """pad_packed_sequence (batch_first=False) + transpose(0,1), with a custom pad row.

    data:        [T_total, F] packed rows (timestep-major PackedSequence order)
    batch_sizes: per-timestep batch sizes (len = max_len)
    pad_row:     [F] value placed at padded positions
    returns:     [batch, max_len, F]
    """
    batch_sizes = np.asarray(batch_sizes)
    max_len = len(batch_sizes)
    batch = int(batch_sizes[0])
    offsets = np.concatenate([[0], np.cumsum(batch_sizes)[:-1]])
    idx = np.zeros((max_len, batch), dtype=np.int32)
    mask = np.zeros((max_len, batch), dtype=bool)
    for t in range(max_len):
        for b in range(int(batch_sizes[t])):
            idx[t, b] = offsets[t] + b
            mask[t, b] = True
    gathered = data[jnp.asarray(idx)]                                   # [max_len, batch, F]
    padded = jnp.where(jnp.asarray(mask)[..., None], gathered, pad_row[None, None, :])
    return jnp.transpose(padded, (1, 0, 2))                             # [batch, max_len, F]


def tagger_forward(packed_x, batch_sizes, params, *, tm=256):
    """Full Tagger.forward (inference): [batch, max_len, output_dim] log-probs."""
    w1, b1, w2, b2 = params["w1"], params["b1"], params["w2"], params["b2"]
    # TODO(synk): dropout (p=0.33) is identity at inference; no RNG dropout in kernel.
    scores_packed = tagger_scores_packed(packed_x, w1, b1, w2, b2, tm=tm)   # [T_total, O]
    # The PyTorch module runs the classifier over zero-padded positions, so padding slots
    # hold the constant row log_softmax(leaky_relu(b2)).
    b2_row = b2.reshape(-1)
    pad_row = jax.nn.log_softmax(jnp.maximum(b2_row, 0.01 * b2_row))
    return pad_packed(scores_packed, batch_sizes, pad_row)


# ---------------- reference (plain JAX, mirrors the original pipeline exactly) ----------------

def tagger_reference(packed_x, batch_sizes, params):
    def lrelu(v):
        return jnp.where(v > 0, v, 0.01 * v)
    h = lrelu(packed_x @ params["w1"] + params["b1"])
    padded = pad_packed(h, batch_sizes, jnp.zeros((h.shape[1],), h.dtype))  # zero-padded like torch
    s = lrelu(padded @ params["w2"] + params["b2"])
    return jax.nn.log_softmax(s, axis=2)


# ---------------- parameter init (deterministic, PyTorch Linear-style) ----------------

def init_params(key, input_dim, dim, output_dim):
    k1, k2, k3, k4 = jax.random.split(key, 4)
    s1 = 1.0 / math.sqrt(input_dim)
    s2 = 1.0 / math.sqrt(dim)
    return {
        "w1": jax.random.uniform(k1, (input_dim, dim), jnp.float32, -s1, s1),
        "b1": jax.random.uniform(k2, (1, dim), jnp.float32, -s1, s1),
        "w2": jax.random.uniform(k3, (dim, output_dim), jnp.float32, -s2, s2),
        "b2": jax.random.uniform(k4, (1, output_dim), jnp.float32, -s2, s2),
    }


if __name__ == "__main__":
    # Small shapes consistent with the module's forward
    input_dim, dim, output_dim = 32, 16, 8
    lengths = [8, 5]                              # sorted descending (PackedSequence convention)
    max_len = lengths[0]
    batch_sizes = [sum(1 for l in lengths if l > t) for t in range(max_len)]  # [2,2,2,2,2,1,1,1]
    T_total = sum(batch_sizes)                    # 13

    key = jax.random.PRNGKey(0)
    k_params, k_x = jax.random.split(key)
    params = init_params(k_params, input_dim, dim, output_dim)
    packed_x = jax.random.normal(k_x, (T_total, input_dim), jnp.float32)

    # tm=8 exercises the multi-tile (pipelined) path at this tiny T; production default is 256.
    scores = tagger_forward(packed_x, batch_sizes, params, tm=8)
    scores = jax.block_until_ready(scores)

    ref = tagger_reference(packed_x, batch_sizes, params)
    np.testing.assert_allclose(np.asarray(scores), np.asarray(ref), rtol=1e-5, atol=1e-5)
    assert scores.shape == (len(lengths), max_len, output_dim)

    print("KERNEL_OK")
</pallas_src>

<mosaic_0001>
module attributes {stable_mosaic.version = 11 : i64} {
  func.func @_tagger_fused_kernel(%arg0: i32, %arg1: memref<8x32xf32, #tpu.memory_space<vmem>>, %arg2: memref<32x16xf32, #tpu.memory_space<vmem>>, %arg3: memref<1x16xf32, #tpu.memory_space<vmem>>, %arg4: memref<16x128xf32, #tpu.memory_space<vmem>>, %arg5: memref<1x128xf32, #tpu.memory_space<vmem>>, %arg6: memref<8x128xf32, #tpu.memory_space<vmem>>) attributes {dimension_semantics = [#tpu.dimension_semantics<parallel>], iteration_bounds = array<i64: 2>, scalar_prefetch = 0 : i64, scratch_operands = 0 : i64, tpu.core_type = #tpu.core_type<tc>, window_params = [{transform_indices = @transform_0, window_bounds = array<i64: 8, 32>}, {pipeline_mode = #tpu.pipeline_mode<synchronous>, transform_indices = @transform_1, window_bounds = array<i64: 32, 16>}, {pipeline_mode = #tpu.pipeline_mode<synchronous>, transform_indices = @transform_2, window_bounds = array<i64: 1, 16>}, {pipeline_mode = #tpu.pipeline_mode<synchronous>, transform_indices = @transform_3, window_bounds = array<i64: 16, 128>}, {pipeline_mode = #tpu.pipeline_mode<synchronous>, transform_indices = @transform_4, window_bounds = array<i64: 1, 128>}, {transform_indices = @transform_5, window_bounds = array<i64: 8, 128>}]} {
    %c0 = arith.constant 0 : index
    %c0_0 = arith.constant 0 : index
    %0 = vector.load %arg1[%c0, %c0_0] : memref<8x32xf32, #tpu.memory_space<vmem>>, vector<8x32xf32>
    %c0_1 = arith.constant 0 : index
    %c0_2 = arith.constant 0 : index
    %1 = vector.load %arg2[%c0_1, %c0_2] : memref<32x16xf32, #tpu.memory_space<vmem>>, vector<32x16xf32>
    %cst = arith.constant dense<0.000000e+00> : vector<8x16xf32>
    %2 = tpu.matmul %0, %1, %cst {dimension_numbers = #tpu.dot_dimension_numbers<[1], [0], [0], [1], [0, 0, 1, 1], [], []>} : vector<8x32xf32>, vector<32x16xf32>, vector<8x16xf32> -> vector<8x16xf32>
    %c0_3 = arith.constant 0 : index
    %c0_4 = arith.constant 0 : index
    %3 = vector.load %arg3[%c0_3, %c0_4] : memref<1x16xf32, #tpu.memory_space<vmem>>, vector<1x16xf32>
    %4 = vector.broadcast %3 : vector<1x16xf32> to vector<8x16xf32>
    %5 = arith.addf %2, %4 : vector<8x16xf32>
    %cst_5 = arith.constant 0.00999999977 : f32
    %6 = vector.broadcast %cst_5 : f32 to vector<8x16xf32>
    %7 = arith.mulf %6, %5 : vector<8x16xf32>
    %8 = arith.maximumf %5, %7 : vector<8x16xf32>
    %c0_6 = arith.constant 0 : index
    %c0_7 = arith.constant 0 : index
    %9 = vector.load %arg4[%c0_6, %c0_7] : memref<16x128xf32, #tpu.memory_space<vmem>>, vector<16x128xf32>
    %cst_8 = arith.constant dense<0.000000e+00> : vector<8x128xf32>
    %10 = tpu.matmul %8, %9, %cst_8 {dimension_numbers = #tpu.dot_dimension_numbers<[1], [0], [0], [1], [0, 0, 1, 1], [], []>} : vector<8x16xf32>, vector<16x128xf32>, vector<8x128xf32> -> vector<8x128xf32>
    %c0_9 = arith.constant 0 : index
    %c0_10 = arith.constant 0 : index
    %11 = vector.load %arg5[%c0_9, %c0_10] : memref<1x128xf32, #tpu.memory_space<vmem>>, vector<1x128xf32>
    %12 = vector.broadcast %11 : vector<1x128xf32> to vector<8x128xf32>
    %13 = arith.addf %10, %12 : vector<8x128xf32>
    %cst_11 = arith.constant 0.00999999977 : f32
    %14 = vector.broadcast %cst_11 : f32 to vector<8x128xf32>
    %15 = arith.mulf %14, %13 : vector<8x128xf32>
    %16 = arith.maximumf %13, %15 : vector<8x128xf32>
    %cst_12 = arith.constant dense<0xFF800000> : vector<8xf32>
    %17 = vector.multi_reduction <maximumf>, %16, %cst_12 [1] : vector<8x128xf32> to vector<8xf32>
    %18 = vector.shape_cast %17 : vector<8xf32> to vector<8x1xf32>
    %19 = vector.broadcast %18 : vector<8x1xf32> to vector<8x128xf32>
    %20 = arith.subf %16, %19 : vector<8x128xf32>
    %21 = math.exp %20 : vector<8x128xf32>
    %cst_13 = arith.constant dense<0.000000e+00> : vector<8xf32>
    %22 = vector.multi_reduction <add>, %21, %cst_13 [1] : vector<8x128xf32> to vector<8xf32>
    %23 = vector.shape_cast %22 : vector<8xf32> to vector<8x1xf32>
    %24 = math.log %23 : vector<8x1xf32>
    %25 = vector.broadcast %24 : vector<8x1xf32> to vector<8x128xf32>
    %26 = arith.subf %20, %25 : vector<8x128xf32>
    %c0_14 = arith.constant 0 : index
    %c0_15 = arith.constant 0 : index
    %27 = vector.load %arg6[%c0_14, %c0_15] : memref<8x128xf32, #tpu.memory_space<vmem>>, vector<8x128xf32>
    tpu.vector_store %arg6[%c0_14, %c0_15], %26 {strides = array<i32>} : memref<8x128xf32, #tpu.memory_space<vmem>>, vector<8x128xf32>,
    return
  }
  func.func @transform_0(%arg0: i32) -> (i32, i32) {
    %c0_i32 = arith.constant 0 : i32
    %c0_i32_0 = arith.constant 0 : i32
    return %arg0, %c0_i32 : i32, i32
  }
  func.func @transform_1(%arg0: i32) -> (i32, i32) {
    %c0_i32 = arith.constant 0 : i32
    %c0_i32_0 = arith.constant 0 : i32
    %c0_i32_1 = arith.constant 0 : i32
    return %c0_i32, %c0_i32_0 : i32, i32
  }
  func.func @transform_2(%arg0: i32) -> (i32, i32) {
    %c0_i32 = arith.constant 0 : i32
    %c0_i32_0 = arith.constant 0 : i32
    %c0_i32_1 = arith.constant 0 : i32
    return %c0_i32, %c0_i32_0 : i32, i32
  }
  func.func @transform_3(%arg0: i32) -> (i32, i32) {
    %c0_i32 = arith.constant 0 : i32
    %c0_i32_0 = arith.constant 0 : i32
    %c0_i32_1 = arith.constant 0 : i32
    return %c0_i32, %c0_i32_0 : i32, i32
  }
  func.func @transform_4(%arg0: i32) -> (i32, i32) {
    %c0_i32 = arith.constant 0 : i32
    %c0_i32_0 = arith.constant 0 : i32
    %c0_i32_1 = arith.constant 0 : i32
    return %c0_i32, %c0_i32_0 : i32, i32
  }
  func.func @transform_5(%arg0: i32) -> (i32, i32) {
    %c0_i32 = arith.constant 0 : i32
    %c0_i32_0 = arith.constant 0 : i32
    return %arg0, %c0_i32 : i32, i32
  }
}

</mosaic_0001>

<bundles_post_ra>
// kernel: tpu_custom_call.1
= control target key start
LH: loop header
LB: loop body
LE: loop exit
PB: predicated region body
PF: predicated region fallthrough
CT: control target
= control target key end

     0   :  { %10 = vsyncpa [#allocation3], 0  ;;  %s633_s0 = inlined_call_operand.vmem [shape: f32[16,32], index: 0, kind: input, shape index: {}]   ;;  %s634_s1 = inlined_call_operand.vmem [shape: f32[32,16], index: 1, kind: input, shape index: {}]   ;;  %s635_s2 = inlined_call_operand.vmem [shape: f32[1,16], index: 2, kind: input, shape index: {}]   ;;  %s636_s3 = inlined_call_operand.vmem [shape: f32[16,128], index: 3, kind: input, shape index: {}]   ;;  %s637_s4 = inlined_call_operand.vmem [shape: f32[1,128], index: 4, kind: input, shape index: {}]   ;;  %s638_s5 = inlined_call_operand.hbm [shape: f32[16,128], index: 5, kind: output, shape index: {}]  }
   0x1   :  { %12 = vsyncpa [#allocation3 + $0x1], 0  ;;  %s524_s18 = smov 0   ;;  %s526_s19 = smov 0  }
   0x2   :  { %s528_s20 = smov 0   ;;  %s530_s21 = smov 0  }
   0x3 LB: > { %s545_s22 = sadd.s32 4294967295, %s492_s21   ;;  %s373_s23 = sadd.s32 4294967294, %s492_s21   ;;  %s492_s21 = sphi %s530_s21, %s644_s21   ;;  %s488_s20 = sphi %s528_s20, %s643_s20   ;;  %s484_s19 = sphi %s526_s19, %s642_s19   ;;  %s480_s18 = sphi %s524_s18, %s641_s18  }
   0x4   : > { %s549_s24 = sadd.s32 1, %s492_s21   ;;  %s135_s25 = sadd.s32 1, %s488_s20 }
   0x5   : > { %s132_s26 = ssub.s32 %s492_s21, %s549_s24  ;;  %p145_p0 = scmp.ne.s32.totalorder %s488_s20, %s484_s19 }
   0x6   : > { %p133_p1 = scmp.eq.s32.totalorder %s132_s26, 0  ;;  %p146_p2 = scmp.eq.s32.totalorder %s545_s22, 1 }
   0x7   : > { %p151_p3 = scmp.ne.s32.totalorder %s484_s19, %s480_s18  ;;  %p152_p4 = scmp.eq.s32.totalorder %s373_s23, 1 }
   0x8   : > { %s560_s27 = scalar_select %p133_p1, %s488_s20, %s135_s25  }
   0x9   : > { %p562_p5 = por %p146_p2, %p145_p0  ;;  %p566_p6 = por %p152_p4, %p151_p3 }
   0xa   : > { %p376_p7 = scmp.ge.s32.totalorder %s492_s21, 1  ;;  %p189_p8 = scmp.lt.s32.totalorder %s492_s21, 3 }
   0xc   : > { %p190_p9 = pnand %p376_p7, %p189_p8 }
   0xd   : > { %p216_p10 = scmp.lt.s32.totalorder (!%p190_p9), %s545_s22, 1  ;;  %s213_s10 = sand.u32 (!%p190_p9), 1, %s484_s19  }
   0xe   : > { %193 = sbr.rel (%p190_p9) target bundleno = 548 (0x224), region = 40  ;;  %s382_s12 = sshll.u32 (!%p190_p9), %s545_s22, 3 }
   0xf   : > { %s309_s15 = scalar_lea.hbm (!%p190_p9), %s638_s5, %s382_s12  ;;  %s299_s25 = scalar_lea.sflag (!%p190_p9), [#allocation3], %s213_s10 }
  0x10   : > { %s313_s23 = sshll.u32 (!%p190_p9), %s309_s15, 4  ;;  %s450_s7 = scalar_lea.hbm (!%p190_p9), %s638_s5, 16  ;;  %s314_s23 = int_to_ptr.hbm [resolvable:$true] %s313_s23 }
  0x11   : > { %s444_s26 = sshra.s32 (!%p190_p9), %s314_s23, 4  ;;  %s445_s26 = int_to_ptr.hbm [resolvable:$true] %s444_s26 }
  0x12   : > { %s446_s30 = scalar_lea.hbm (!%p190_p9), %s445_s26, 8  ;;  %p451_p0 = scmp.lt.s32.totalorder (!%p190_p9), %s445_s26, %s638_s5 }
  0x13   : > { %v224_v0 = vld [vmem:[%s634_s1 + $0x18] sm:$0xff]  ;;  %v223_v1 = vld [vmem:[%s634_s1 + $0x10] sm:$0xff]  ;;  %v222_v2 = vld [vmem:[%s634_s1 + $0x8] sm:$0xff]  ;;  %s217_s11 = scalar_select %p216_p10, %s545_s22, 1  ;;  %vm229_vm0 = vcmask 261120   ;;  %vm261_vm1 = vcmask 130048  }
  0x14   : > { %245 = vmatpush.msra.mxu0 %v224_v0  ;;  %v221_v3 = vld [vmem:[%s634_s1] sm:$0xff]  ;;  %v256_v5 = vld [vmem:[%s636_s3 + $0x8] sm:$0xff]  ;;  %p447_p11 = scmp.ne.s32.totalorder %s445_s26, %s446_s30  ;;  %p452_p1 = scmp.lt.s32.totalorder %s450_s7, %s446_s30 }
  0x15   : > { %s378_s14 = sshll.u32 %s217_s11, 3  ;;  %279 = vmatpush.msra.mxu1 %v256_v5  ;;  %v255_v6 = vld [vmem:[%s636_s3] sm:$0xff]  ;;  %s377_s11 = sshll.u32 %s213_s10, 3 }
  0x16   : > { %246 = vmatpush.msra.mxu0 %v223_v1  ;;  %s219_s17 = scalar_lea.vmem %s633_s0, %s378_s14  ;;  %v424_v7 = vld [vmem:[%s635_s2] ss:$0 sm:$0xff]  ;;  %s215_s16 = scalar_lea.vmem [#allocation2], %s377_s11 }
  0x17   : > { %v220_v4 = vld [vmem:[%s219_s17] sm:$0xff]  ;;  %280 = vmatpush.msra.mxu1 %v255_v6  ;;  %s311_s17 = sshll.u32 %s215_s16, 4  ;;  %p448_p12 = pnand %p447_p11, %p562_p5  ;;  %s312_s17 = int_to_ptr.vmem [resolvable:$true] %s311_s17 }
  0x18   : > { %247 = vmatpush.msra.mxu0 %v222_v2  ;;  %v425_v12 = vld [vmem:[%s637_s4] ss:$0 sm:$0xff]  ;;  %p453_p2 = por %p452_p1, %p451_p0 }
  0x19   : > { %p449_p13 = pneg %p448_p12 }
  0x1a   : > { %248 = vmatpush.msra.mxu0 %v221_v3 }
  0x1b   : > { %379 = vmatmul.msk.f32.vlgmr.msra.gmra.mxu0 %vm229_vm0, %v220_v4  ;;  %p454_p3 = pnand %p453_p2, %p449_p13 }
  0x98   : > { %v250_v8 = vpop.f32.mrf.mxu0 }
  0x99   : > { %v251_v9 = vadd.f32 %v424_v7, %v250_v8 }
  0x9b   : > { %v253_v10 = vmul.f32 0.01, %v251_v9 }
  0x9d   : > { %v254_v11 = vmax.f32 %v251_v9, %v253_v10 }
  0x9f   : > { %380 = vmatmul.msk.f32.vlgmr.msra.gmra.mxu1 %vm261_vm1, %v254_v11 }
 0x11c   : > { %v282_v13 = vpop.f32.mrf.mxu1 }
 0x11d   : > { %v283_v14 = vadd.f32 %v425_v12, %v282_v13 }
 0x11f   : > { %v285_v15 = vmul.f32 0.01, %v283_v14 }
 0x121   : > { %v286_v16 = vmax.f32 %v283_v14, %v285_v15 }
 0x123   : > { %287 = vmax.xlane.f32.xlu0 %v286_v16 }
 0x196   : > { %v288_v17 = vpop.xlane.xlu0 %287 }
 0x197   : > { %v289_v18 = vsub.f32 %v286_v16, %v288_v17 }
 0x199   : > { %v290_v19 = vmul.f32 1.442695, %v289_v18 }
 0x19b   : > { %426 = vpow2.f32 %v290_v19 }
 0x1a1   : > { %v427_v20 = vpop.eup %426 }
 0x1a2   : > { %292 = vadd.xlane.f32.xlu0 %v427_v20 }
 0x215   : > { %v293_v21 = vpop.xlane.xlu0 %292 }
 0x216   : > { %428 = vlog2.f32 %v293_v21 }
 0x21c   : > { %v429_v22 = vpop.eup %428 }
 0x21d   : > { %v295_v23 = vmul.f32 0.6931472, %v429_v22 }
 0x21f   : > { %v296_v24 = vsub.f32 %v289_v18, %v295_v23 }
 0x221   : > { %297 = vst [vmem:[%s215_s16] sm:$0xff] %v296_v24 }
 0x222   : > { %457 = shalt.err (!%p454_p3)
}
 0x223   : > { %385 = dma.vmem_to_hbm [thread:$0]  (%p562_p5), %s312_s17, 128, %s314_s23, %s299_s25  }
 0x224 PF: > { %p391_p4 = scmp.ge.s32.totalorder %s492_s21, 2  ;;  %s325_s10 = sand.u32 1, %s480_s18  }
 0x225   : > { %s326_s11 = scalar_lea.sflag [#allocation3], %s325_s10 }
 0x226   : > { %p388_p7 = pnand %p391_p4, %p566_p6 }
 0x228   : > { %p389_p8 = pneg %p388_p7 }
 0x22a   : > { %475 = dma.done.wait (%p389_p8), %s326_s11, 128  }
 0x22b   : > { %477 = vsyncadd (%p389_p8), %s326_s11, 4294967168  ;;  %p15_p9 = scmp.ge.s32.totalorder %s549_s24, 4   ;;  %s641_s18 = smov %s484_s19 }
 0x22c   : > { %s642_s19 = smov %s488_s20  ;;  %s643_s20 = smov %s560_s27 }
 0x22d   : > { %s644_s21 = smov %s549_s24  ;;  %17 = sbr.rel (!%p15_p9) target bundleno = 3 (0x3), region = 75 }
 0x232   :  { %332 = vsyncpa [#allocation3], 1 }
 0x233   :  { %334 = vsyncpa [#allocation3 + $0x1], 1 }

</bundles_post_ra>
